<compile_context>
chip_gen: v5e
topology: v5e:2x2
jax: 0.10.0
libtpu: 0.0.40
codegen_flags: <defaults>
</compile_context>

<pallas_src>
import functools

import jax
import jax.numpy as jnp
import numpy as np
from jax.experimental import pallas as pl
from jax.experimental.pallas import tpu as pltpu

_SUBLANE = 8


def _round_up(x, m):
    return ((x + m - 1) // m) * m


# ----------------------------- kernels --------------------------------------


def _att_kernel(num_layers):
    def kernel(*refs):
        x_refs = refs[:num_layers]
        aw_ref, w_ref, b_ref, o_ref = refs[num_layers:]
        aw = aw_ref[...]                                        # [1, H]
        xf = [r[...].astype(jnp.float32) for r in x_refs]       # each [TM, H]
        # per-layer attention scores  s_l[n] = <x_l[n, :], att_w>
        # (the Linear(H,1) bias cancels in the softmax over layers)
        scores = [jnp.sum(x * aw, axis=-1, keepdims=True) for x in xf]  # [TM,1]
        m = functools.reduce(jnp.maximum, scores)
        exps = [jnp.exp(s - m) for s in scores]
        tot = functools.reduce(jnp.add, exps)
        inv = 1.0 / tot
        comb = (exps[0] * inv) * xf[0]
        for l in range(1, num_layers):
            comb = comb + (exps[l] * inv) * xf[l]               # [TM, H]
        h = jnp.maximum(comb, 0.0)                              # relu
        out = jnp.dot(h, w_ref[...], preferred_element_type=jnp.float32) + b_ref[...]
        o_ref[...] = out.astype(o_ref.dtype)
    return kernel


def _combine_kernel(mode, num_layers):
    def kernel(*refs):
        x_refs = refs[:num_layers]
        w_ref, b_ref, o_ref = refs[num_layers:]
        comb = x_refs[0][...].astype(jnp.float32)
        for l in range(1, num_layers):
            xl = x_refs[l][...].astype(jnp.float32)
            comb = jnp.maximum(comb, xl) if mode == "max" else comb + xl
        if mode == "mean":
            comb = comb * (1.0 / num_layers)
        h = jnp.maximum(comb, 0.0)                              # relu
        out = jnp.dot(h, w_ref[...], preferred_element_type=jnp.float32) + b_ref[...]
        o_ref[...] = out.astype(o_ref.dtype)
    return kernel


def _cat_kernel(num_layers):
    def kernel(*refs):
        x_refs = refs[:num_layers]
        w_ref, b_ref, o_ref = refs[num_layers:]
        # relu(cat(xs)) @ W_cat  ==  sum_l relu(x_l) @ W_cat[l-th slab]
        acc = jnp.zeros(o_ref.shape, jnp.float32)
        for l in range(num_layers):
            h = jnp.maximum(x_refs[l][...].astype(jnp.float32), 0.0)
            acc = acc + jnp.dot(h, w_ref[l], preferred_element_type=jnp.float32)
        o_ref[...] = (acc + b_ref[...]).astype(o_ref.dtype)
    return kernel


# ----------------------------- wrapper ---------------------------------------


def la_aggregator(xs, mode, lin_w, lin_b, att_w=None, *, row_tile=512,
                  x_dtype=None):
    """Fused LaAggregator forward.

    xs    : list of L arrays [N, H]  (per-layer node embeddings)
    lin_w : [H, H]  (mode != 'cat') or [L*H, H]  (mode == 'cat'),
            input-major: y = x @ lin_w + lin_b  (== torch Linear weight.T)
    lin_b : [H]
    att_w : [H]     (only for mode == 'att'; the att-Linear bias cancels
                     in the softmax over layers, so it is not needed)
    x_dtype : optional streaming dtype for the activations (e.g. jnp.bfloat16
              to halve HBM reads when the cast can be amortized). Default: none.
    """
    num_layers = len(xs)
    N, H = xs[0].shape

    # Clamp the row tile so the double-buffered activation blocks stay well
    # inside VMEM (conservative for v7x's 64 MiB / 32 MiB scoped default).
    itemsize = (np.dtype(x_dtype).itemsize if x_dtype is not None
                else np.dtype(xs[0].dtype).itemsize)
    budget = 16 * 1024 * 1024
    max_tm = budget // max(1, 2 * num_layers * H * itemsize)
    max_tm = max(_SUBLANE, (max_tm // _SUBLANE) * _SUBLANE)
    row_tile = min(row_tile, max_tm)

    if N <= row_tile:
        Np, TM = N, N                       # single block, full-extent rows
    else:
        TM = row_tile                       # multiple of 8
        Np = _round_up(N, TM)

    def prep(a):
        if x_dtype is not None:
            a = a.astype(x_dtype)
        if Np != N:
            a = jnp.pad(a, ((0, Np - N), (0, 0)))
        return a

    xp = [prep(a) for a in xs]
    lin_b_p = lin_b.reshape(1, H).astype(jnp.float32)

    grid = (Np // TM,)
    x_spec = pl.BlockSpec((TM, H), lambda i: (i, 0))
    res2d = lambda shape: pl.BlockSpec(shape, lambda i: (0, 0))    # VMEM-resident
    out_spec = pl.BlockSpec((TM, H), lambda i: (i, 0))
    cparams = pltpu.CompilerParams(dimension_semantics=("parallel",))
    out_shape = jax.ShapeDtypeStruct((Np, H), jnp.float32)

    if mode == "att":
        assert att_w is not None, "mode='att' needs att_w"
        aw = att_w.reshape(1, H).astype(jnp.float32)
        w = lin_w.astype(jnp.float32)
        out = pl.pallas_call(
            _att_kernel(num_layers),
            out_shape=out_shape,
            grid=grid,
            in_specs=[x_spec] * num_layers + [
                res2d((1, H)),              # att weight (resident)
                res2d((H, H)),              # lin weight (resident)
                res2d((1, H)),              # lin bias   (resident)
            ],
            out_specs=out_spec,
            compiler_params=cparams,
        )(*xp, aw, w, lin_b_p)
    elif mode in ("sum", "mean", "max"):
        w = lin_w.astype(jnp.float32)
        out = pl.pallas_call(
            _combine_kernel(mode, num_layers),
            out_shape=out_shape,
            grid=grid,
            in_specs=[x_spec] * num_layers + [res2d((H, H)), res2d((1, H))],
            out_specs=out_spec,
            compiler_params=cparams,
        )(*xp, w, lin_b_p)
    elif mode == "cat":
        w3 = lin_w.astype(jnp.float32).reshape(num_layers, H, H)
        out = pl.pallas_call(
            _cat_kernel(num_layers),
            out_shape=out_shape,
            grid=grid,
            in_specs=[x_spec] * num_layers + [
                pl.BlockSpec((num_layers, H, H), lambda i: (0, 0, 0)),
                res2d((1, H)),
            ],
            out_specs=out_spec,
            compiler_params=cparams,
        )(*xp, w3, lin_b_p)
    else:
        # TODO(synk): mode == 'lstm' (JumpingKnowledge LSTM attention) not implemented.
        raise NotImplementedError(f"LaAggregator mode '{mode}' not implemented")

    return out[:N] if Np != N else out


# ----------------------------- demo / self-check ------------------------------

if __name__ == "__main__":
    key = jax.random.PRNGKey(0)
    keys = jax.random.split(key, 8)

    num_layers, N, hidden = 3, 64, 32
    xs = [jax.random.normal(keys[i], (N, hidden), jnp.float32)
          for i in range(num_layers)]

    limit = (6.0 / (hidden + hidden)) ** 0.5
    lin_w = jax.random.uniform(keys[3], (hidden, hidden), jnp.float32, -limit, limit)
    lin_b = 0.1 * jax.random.normal(keys[4], (hidden,), jnp.float32)
    att_w = 0.1 * jax.random.normal(keys[5], (hidden,), jnp.float32)
    att_b = 0.05 * jax.random.normal(keys[6], (1,), jnp.float32)   # cancels in softmax
    limit_c = (6.0 / (num_layers * hidden + hidden)) ** 0.5
    lin_w_cat = jax.random.uniform(keys[7], (num_layers * hidden, hidden),
                                   jnp.float32, -limit_c, limit_c)

    def reference(mode):
        xst = jnp.stack(xs, axis=-1)                      # [N, H, L]
        if mode == "att":
            inp = jnp.transpose(xst, (0, 2, 1))           # [N, L, H]
            s = inp @ att_w.reshape(hidden, 1) + att_b    # [N, L, 1]
            w = jax.nn.softmax(s, axis=1)
            out = jnp.sum(inp * w, axis=1)
        elif mode == "sum":
            out = xst.sum(-1)
        elif mode == "mean":
            out = xst.mean(-1)
        elif mode == "max":
            out = xst.max(-1)
        elif mode == "cat":
            out = jnp.concatenate(xs, axis=-1)
        h = jnp.maximum(out, 0.0)
        w_lin = lin_w_cat if mode == "cat" else lin_w
        return h @ w_lin + lin_b

    for mode in ("att", "sum", "mean", "max", "cat"):
        w_lin = lin_w_cat if mode == "cat" else lin_w
        ref = reference(mode)
        # exercise both the single-block path and the 2-block "parallel" grid path
        for rt in (512, 32):
            out = la_aggregator(xs, mode, w_lin, lin_b, att_w=att_w, row_tile=rt)
            jax.block_until_ready(out)
            assert out.shape == (N, hidden), (mode, rt, out.shape)
            assert bool(jnp.all(jnp.isfinite(out))), (mode, rt)
            err = float(jnp.max(jnp.abs(out - ref)))
            assert err < 1e-1, (mode, rt, err)

    # optional bf16 streaming path (halved HBM reads; looser tolerance)
    out = la_aggregator(xs, "mean", lin_w, lin_b, x_dtype=jnp.bfloat16)
    jax.block_until_ready(out)
    err = float(jnp.max(jnp.abs(out - reference("mean"))))
    assert err < 2e-1, ("mean-bf16", err)

    print("KERNEL_OK")
</pallas_src>

<mosaic_0001>
module attributes {stable_mosaic.version = 11 : i64} {
  func.func @kernel(%arg0: i32, %arg1: memref<64x32xf32, #tpu.memory_space<vmem>>, %arg2: memref<64x32xf32, #tpu.memory_space<vmem>>, %arg3: memref<64x32xf32, #tpu.memory_space<vmem>>, %arg4: memref<1x32xf32, #tpu.memory_space<vmem>>, %arg5: memref<32x32xf32, #tpu.memory_space<vmem>>, %arg6: memref<1x32xf32, #tpu.memory_space<vmem>>, %arg7: memref<64x32xf32, #tpu.memory_space<vmem>>) attributes {dimension_semantics = [#tpu.dimension_semantics<parallel>], iteration_bounds = array<i64: 1>, scalar_prefetch = 0 : i64, scratch_operands = 0 : i64, tpu.core_type = #tpu.core_type<tc>, window_params = [{transform_indices = @transform_0, window_bounds = array<i64: 64, 32>}, {transform_indices = @transform_1, window_bounds = array<i64: 64, 32>}, {transform_indices = @transform_2, window_bounds = array<i64: 64, 32>}, {pipeline_mode = #tpu.pipeline_mode<synchronous>, transform_indices = @transform_3, window_bounds = array<i64: 1, 32>}, {pipeline_mode = #tpu.pipeline_mode<synchronous>, transform_indices = @transform_4, window_bounds = array<i64: 32, 32>}, {pipeline_mode = #tpu.pipeline_mode<synchronous>, transform_indices = @transform_5, window_bounds = array<i64: 1, 32>}, {transform_indices = @transform_6, window_bounds = array<i64: 64, 32>}]} {
    %c0 = arith.constant 0 : index
    %c0_0 = arith.constant 0 : index
    %0 = vector.load %arg4[%c0, %c0_0] : memref<1x32xf32, #tpu.memory_space<vmem>>, vector<1x32xf32>
    %c0_1 = arith.constant 0 : index
    %c0_2 = arith.constant 0 : index
    %1 = vector.load %arg1[%c0_1, %c0_2] : memref<64x32xf32, #tpu.memory_space<vmem>>, vector<64x32xf32>
    %c0_3 = arith.constant 0 : index
    %c0_4 = arith.constant 0 : index
    %2 = vector.load %arg2[%c0_3, %c0_4] : memref<64x32xf32, #tpu.memory_space<vmem>>, vector<64x32xf32>
    %c0_5 = arith.constant 0 : index
    %c0_6 = arith.constant 0 : index
    %3 = vector.load %arg3[%c0_5, %c0_6] : memref<64x32xf32, #tpu.memory_space<vmem>>, vector<64x32xf32>
    %4 = vector.broadcast %0 : vector<1x32xf32> to vector<64x32xf32>
    %5 = arith.mulf %1, %4 : vector<64x32xf32>
    %cst = arith.constant dense<0.000000e+00> : vector<64xf32>
    %6 = vector.multi_reduction <add>, %5, %cst [1] : vector<64x32xf32> to vector<64xf32>
    %7 = vector.shape_cast %6 : vector<64xf32> to vector<64x1xf32>
    %8 = vector.broadcast %0 : vector<1x32xf32> to vector<64x32xf32>
    %9 = arith.mulf %2, %8 : vector<64x32xf32>
    %cst_7 = arith.constant dense<0.000000e+00> : vector<64xf32>
    %10 = vector.multi_reduction <add>, %9, %cst_7 [1] : vector<64x32xf32> to vector<64xf32>
    %11 = vector.shape_cast %10 : vector<64xf32> to vector<64x1xf32>
    %12 = vector.broadcast %0 : vector<1x32xf32> to vector<64x32xf32>
    %13 = arith.mulf %3, %12 : vector<64x32xf32>
    %cst_8 = arith.constant dense<0.000000e+00> : vector<64xf32>
    %14 = vector.multi_reduction <add>, %13, %cst_8 [1] : vector<64x32xf32> to vector<64xf32>
    %15 = vector.shape_cast %14 : vector<64xf32> to vector<64x1xf32>
    %16 = arith.maximumf %7, %11 : vector<64x1xf32>
    %17 = arith.maximumf %16, %15 : vector<64x1xf32>
    %18 = arith.subf %7, %17 : vector<64x1xf32>
    %19 = math.exp %18 : vector<64x1xf32>
    %20 = arith.subf %11, %17 : vector<64x1xf32>
    %21 = math.exp %20 : vector<64x1xf32>
    %22 = arith.subf %15, %17 : vector<64x1xf32>
    %23 = math.exp %22 : vector<64x1xf32>
    %24 = arith.addf %19, %21 : vector<64x1xf32>
    %25 = arith.addf %24, %23 : vector<64x1xf32>
    %cst_9 = arith.constant 1.000000e+00 : f32
    %26 = vector.broadcast %cst_9 : f32 to vector<64x1xf32>
    %27 = arith.divf %26, %25 : vector<64x1xf32>
    %28 = arith.mulf %19, %27 : vector<64x1xf32>
    %29 = vector.broadcast %28 : vector<64x1xf32> to vector<64x32xf32>
    %30 = arith.mulf %29, %1 : vector<64x32xf32>
    %31 = arith.mulf %21, %27 : vector<64x1xf32>
    %32 = vector.broadcast %31 : vector<64x1xf32> to vector<64x32xf32>
    %33 = arith.mulf %32, %2 : vector<64x32xf32>
    %34 = arith.addf %30, %33 : vector<64x32xf32>
    %35 = arith.mulf %23, %27 : vector<64x1xf32>
    %36 = vector.broadcast %35 : vector<64x1xf32> to vector<64x32xf32>
    %37 = arith.mulf %36, %3 : vector<64x32xf32>
    %38 = arith.addf %34, %37 : vector<64x32xf32>
    %cst_10 = arith.constant 0.000000e+00 : f32
    %39 = vector.broadcast %cst_10 : f32 to vector<64x32xf32>
    %40 = arith.maximumf %38, %39 : vector<64x32xf32>
    %c0_11 = arith.constant 0 : index
    %c0_12 = arith.constant 0 : index
    %41 = vector.load %arg5[%c0_11, %c0_12] : memref<32x32xf32, #tpu.memory_space<vmem>>, vector<32x32xf32>
    %cst_13 = arith.constant dense<0.000000e+00> : vector<64x32xf32>
    %42 = tpu.matmul %40, %41, %cst_13 {dimension_numbers = #tpu.dot_dimension_numbers<[1], [0], [0], [1], [0, 0, 1, 1], [], []>} : vector<64x32xf32>, vector<32x32xf32>, vector<64x32xf32> -> vector<64x32xf32>
    %c0_14 = arith.constant 0 : index
    %c0_15 = arith.constant 0 : index
    %43 = vector.load %arg6[%c0_14, %c0_15] : memref<1x32xf32, #tpu.memory_space<vmem>>, vector<1x32xf32>
    %44 = vector.broadcast %43 : vector<1x32xf32> to vector<64x32xf32>
    %45 = arith.addf %42, %44 : vector<64x32xf32>
    %c0_16 = arith.constant 0 : index
    %c0_17 = arith.constant 0 : index
    %46 = vector.load %arg7[%c0_16, %c0_17] : memref<64x32xf32, #tpu.memory_space<vmem>>, vector<64x32xf32>
    tpu.vector_store %arg7[%c0_16, %c0_17], %45 {strides = array<i32>} : memref<64x32xf32, #tpu.memory_space<vmem>>, vector<64x32xf32>,
    return
  }
  func.func @transform_0(%arg0: i32) -> (i32, i32) {
    %c0_i32 = arith.constant 0 : i32
    %c0_i32_0 = arith.constant 0 : i32
    return %arg0, %c0_i32 : i32, i32
  }
  func.func @transform_1(%arg0: i32) -> (i32, i32) {
    %c0_i32 = arith.constant 0 : i32
    %c0_i32_0 = arith.constant 0 : i32
    return %arg0, %c0_i32 : i32, i32
  }
  func.func @transform_2(%arg0: i32) -> (i32, i32) {
    %c0_i32 = arith.constant 0 : i32
    %c0_i32_0 = arith.constant 0 : i32
    return %arg0, %c0_i32 : i32, i32
  }
  func.func @transform_3(%arg0: i32) -> (i32, i32) {
    %c0_i32 = arith.constant 0 : i32
    %c0_i32_0 = arith.constant 0 : i32
    %c0_i32_1 = arith.constant 0 : i32
    return %c0_i32, %c0_i32_0 : i32, i32
  }
  func.func @transform_4(%arg0: i32) -> (i32, i32) {
    %c0_i32 = arith.constant 0 : i32
    %c0_i32_0 = arith.constant 0 : i32
    %c0_i32_1 = arith.constant 0 : i32
    return %c0_i32, %c0_i32_0 : i32, i32
  }
  func.func @transform_5(%arg0: i32) -> (i32, i32) {
    %c0_i32 = arith.constant 0 : i32
    %c0_i32_0 = arith.constant 0 : i32
    %c0_i32_1 = arith.constant 0 : i32
    return %c0_i32, %c0_i32_0 : i32, i32
  }
  func.func @transform_6(%arg0: i32) -> (i32, i32) {
    %c0_i32 = arith.constant 0 : i32
    %c0_i32_0 = arith.constant 0 : i32
    return %arg0, %c0_i32 : i32, i32
  }
}

</mosaic_0001>

<bundles_post_ra>
// kernel: tpu_custom_call.1
= control target key start
LH: loop header
LB: loop body
LE: loop exit
PB: predicated region body
PF: predicated region fallthrough
CT: control target
= control target key end

     0   :  { %vm59_vm0 = vcmask 261120   ;;  %s1125_s2 = inlined_call_operand.vmem [shape: f32[64,32], index: 2, kind: input, shape index: {}]   ;;  %s1126_s3 = inlined_call_operand.vmem [shape: f32[1,32], index: 3, kind: input, shape index: {}]   ;;  %s1127_s1 = inlined_call_operand.vmem [shape: f32[64,32], index: 1, kind: input, shape index: {}]   ;;  %s1128_s0 = inlined_call_operand.vmem [shape: f32[64,32], index: 0, kind: input, shape index: {}]   ;;  %s1129_s5 = inlined_call_operand.vmem [shape: f32[1,32], index: 5, kind: input, shape index: {}]   ;;  %s1130_s4 = inlined_call_operand.vmem [shape: f32[32,32], index: 4, kind: input, shape index: {}]   ;;  %s1131_s6 = inlined_call_operand.vmem [shape: f32[64,32], index: 6, kind: output, shape index: {}]  }
   0x1   :  { %v653_v0 = vld [vmem:[%s1125_s2 + $0x20] sm:$0xff]  ;;  %v679_v7 = vld [vmem:[%s1125_s2 + $0x30] sm:$0xff]  ;;  %v730_v28 = vld [vmem:[%s1128_s0 + $0x38] sm:$0xff] }
   0x2   :  { %v658_v1 = vld [vmem:[%s1126_s3] ss:$0 sm:$0xff]  ;;  %v684_v8 = vld [vmem:[%s1127_s1 + $0x30] sm:$0xff]  ;;  %v735_v29 = vld [vmem:[%s1128_s0 + $0x28] sm:$0xff] }
   0x3   :  { %v663_v2 = vld [vmem:[%s1127_s1 + $0x20] sm:$0xff]  ;;  %v120_v4 = vmul.f32 %v658_v1, %v653_v0  ;;  %v692_v12 = vld [vmem:[%s1128_s0 + $0x30] sm:$0xff]  ;;  %v122_v13 = vmul.f32 %v658_v1, %v679_v7  ;;  %v90_v14 = vmul.f32 %v658_v1, %v684_v8  ;;  %v58_v31 = vmul.f32 %v658_v1, %v730_v28  ;;  %v759_v38 = vld [vmem:[%s1127_s1 + $0x38] sm:$0xff] }
   0x4   :  { %v668_v3 = vld [vmem:[%s1128_s0 + $0x20] sm:$0xff]  ;;  %v88_v5 = vmul.f32 %v658_v1, %v663_v2  ;;  %v57_v15 = vmul.f32 %v658_v1, %v692_v12  ;;  %v711_v20 = vld [vmem:[%s1128_s0 + $0x10] sm:$0xff]  ;;  %v56_v32 = vmul.f32 %v658_v1, %v735_v29  ;;  %v764_v39 = vld [vmem:[%s1127_s1 + $0x28] sm:$0xff]  ;;  %v91_v41 = vmul.f32 %v658_v1, %v759_v38 }
   0x5   :  { %v55_v6 = vmul.f32 %v658_v1, %v668_v3  ;;  %v136_v9 = vsel %vm59_vm0, %v120_v4, 0.0  ;;  %v142_v16 = vsel %vm59_vm0, %v122_v13, 0.0  ;;  %v110_v17 = vsel %vm59_vm0, %v90_v14, 0.0  ;;  %v706_v19 = vld [vmem:[%s1127_s1] sm:$0xff]  ;;  %v740_v30 = vld [vmem:[%s1127_s1 + $0x10] sm:$0xff]  ;;  %v778_v46 = vld [vmem:[%s1125_s2 + $0x38] sm:$0xff] }
   0x6   :  { %v104_v10 = vsel %vm59_vm0, %v88_v5, 0.0  ;;  %137 = vadd.xlane.f32.xlu2 %v136_v9  ;;  %v78_v18 = vsel %vm59_vm0, %v57_v15, 0.0  ;;  %v716_v21 = vld [vmem:[%s1128_s0] sm:$0xff]  ;;  %v84_v22 = vmul.f32 %v658_v1, %v706_v19  ;;  %v53_v23 = vmul.f32 %v658_v1, %v711_v20  ;;  %v783_v47 = vld [vmem:[%s1125_s2 + $0x28] sm:$0xff]  ;;  %v788_v48 = vld [vmem:[%s1125_s2 + $0x10] sm:$0xff] }
   0x7   :  { %v72_v11 = vsel %vm59_vm0, %v55_v6, 0.0  ;;  %105 = vadd.xlane.f32.xlu1 %v104_v10  ;;  %v51_v24 = vmul.f32 %v658_v1, %v716_v21  ;;  %v86_v33 = vmul.f32 %v658_v1, %v740_v30  ;;  %v81_v34 = vsel %vm59_vm0, %v58_v31, 0.0  ;;  %v754_v37 = vld [vmem:[%s1125_s2] sm:$0xff]  ;;  %v802_v55 = vld [vmem:[%s1127_s1 + $0x8] sm:$0xff]  ;;  %v807_v56 = vld [vmem:[%s1128_s0 + $0x18] sm:$0xff] }
   0x8   :  { %73 = vadd.xlane.f32.xlu0 %v72_v11  ;;  %v92_v25 = vsel %vm59_vm0, %v84_v22, 0.0  ;;  %v66_v26 = vsel %vm59_vm0, %v53_v23, 0.0  ;;  %v75_v35 = vsel %vm59_vm0, %v56_v32, 0.0  ;;  %v116_v40 = vmul.f32 %v658_v1, %v754_v37  ;;  %v812_v57 = vld [vmem:[%s1128_s0 + $0x8] sm:$0xff]  ;;  %v831_v5 = vld [vmem:[%s1125_s2 + $0x18] sm:$0xff] }
   0x9   :  { %v60_v27 = vsel %vm59_vm0, %v51_v24, 0.0  ;;  %v98_v36 = vsel %vm59_vm0, %v86_v33, 0.0  ;;  %v89_v42 = vmul.f32 %v658_v1, %v764_v39  ;;  %v113_v44 = vsel %vm59_vm0, %v91_v41, 0.0  ;;  %v826_v4 = vld [vmem:[%s1125_s2 + $0x8] sm:$0xff]  ;;  %v836_v6 = vld [vmem:[%s1127_s1 + $0x18] sm:$0xff] }
   0xa   :  { %v124_v43 = vsel %vm59_vm0, %v116_v40, 0.0  ;;  %v123_v49 = vmul.f32 %v658_v1, %v778_v46  ;;  %v121_v50 = vmul.f32 %v658_v1, %v783_v47  ;;  %v118_v51 = vmul.f32 %v658_v1, %v788_v48 }
   0xb   :  { %v107_v45 = vsel %vm59_vm0, %v89_v42, 0.0  ;;  %v85_v58 = vmul.f32 %v658_v1, %v802_v55  ;;  %v54_v59 = vmul.f32 %v658_v1, %v807_v56  ;;  %v52_v60 = vmul.f32 %v658_v1, %v812_v57 }
   0xc   :  { %v145_v52 = vsel %vm59_vm0, %v123_v49, 0.0  ;;  %v139_v53 = vsel %vm59_vm0, %v121_v50, 0.0  ;;  %v130_v54 = vsel %vm59_vm0, %v118_v51, 0.0  ;;  %v117_v9 = vmul.f32 %v658_v1, %v826_v4 }
   0xd   :  { %v95_v61 = vsel %vm59_vm0, %v85_v58, 0.0  ;;  %v69_v62 = vsel %vm59_vm0, %v54_v59, 0.0  ;;  %v63_v63 = vsel %vm59_vm0, %v52_v60, 0.0  ;;  %v119_v10 = vmul.f32 %v658_v1, %v831_v5  ;;  %v446_v59 = vld [vmem:[%s1130_s4 + $0x10] sm:$0xff] }
   0xe   :  { %143 = vadd.xlane.f32.xlu2 %v142_v16  ;;  %v87_v11 = vmul.f32 %v658_v1, %v836_v6  ;;  %v127_v13 = vsel %vm59_vm0, %v117_v9, 0.0 }
   0xf   :  { %111 = vadd.xlane.f32.xlu1 %v110_v17  ;;  %v133_v14 = vsel %vm59_vm0, %v119_v10, 0.0 }
  0x10   :  { %79 = vadd.xlane.f32.xlu0 %v78_v18  ;;  %v101_v15 = vsel %vm59_vm0, %v87_v11, 0.0 }
  0x16   :  { %93 = vadd.xlane.f32.xlu2 %v92_v25 }
  0x17   :  { %67 = vadd.xlane.f32.xlu1 %v66_v26 }
  0x18   :  { %61 = vadd.xlane.f32.xlu0 %v60_v27 }
  0x1e   :  { %82 = vadd.xlane.f32.xlu2 %v81_v34 }
  0x1f   :  { %76 = vadd.xlane.f32.xlu1 %v75_v35 }
  0x20   :  { %99 = vadd.xlane.f32.xlu0 %v98_v36  ;;  %v447_v36 = vld [vmem:[%s1130_s4 + $0x18] sm:$0xff] }
  0x21   :  { %538 = vmatpush.msra.mxu2 %v447_v36  ;;  %539 = vmatpush.msra.mxu3 %v447_v36 }
  0x22   :  { %488 = vmatpush.msra.mxu0 %v447_v36  ;;  %537 = vmatpush.msra.mxu1 %v447_v36 }
  0x23   :  { %541 = vmatpush.msra.mxu2 %v446_v59  ;;  %542 = vmatpush.msra.mxu3 %v446_v59 }
  0x24   :  { %489 = vmatpush.msra.mxu0 %v446_v59  ;;  %540 = vmatpush.msra.mxu1 %v446_v59 }
  0x26   :  { %125 = vadd.xlane.f32.xlu2 %v124_v43 }
  0x27   :  { %114 = vadd.xlane.f32.xlu1 %v113_v44 }
  0x28   :  { %108 = vadd.xlane.f32.xlu0 %v107_v45 }
  0x2e   :  { %146 = vadd.xlane.f32.xlu2 %v145_v52 }
  0x2f   :  { %140 = vadd.xlane.f32.xlu1 %v139_v53 }
  0x30   :  { %131 = vadd.xlane.f32.xlu0 %v130_v54 }
  0x36   :  { %96 = vadd.xlane.f32.xlu2 %v95_v61 }
  0x37   :  { %70 = vadd.xlane.f32.xlu1 %v69_v62  ;;  %v445_v62 = vld [vmem:[%s1130_s4 + $0x8] sm:$0xff] }
  0x38   :  { %64 = vadd.xlane.f32.xlu0 %v63_v63  ;;  %544 = vmatpush.msra.mxu2 %v445_v62  ;;  %v444_v63 = vld [vmem:[%s1130_s4] sm:$0xff] }
  0x39   :  { %545 = vmatpush.msra.mxu3 %v445_v62  ;;  %490 = vmatpush.msra.mxu0 %v445_v62 }
  0x3a   :  { %543 = vmatpush.msra.mxu1 %v445_v62  ;;  %547 = vmatpush.msra.mxu2 %v444_v63 }
  0x3b   :  { %548 = vmatpush.msra.mxu3 %v444_v63  ;;  %491 = vmatpush.msra.mxu0 %v444_v63 }
  0x3c   :  { %546 = vmatpush.msra.mxu1 %v444_v63 }
  0x3e   :  { %134 = vadd.xlane.f32.xlu2 %v133_v14 }
  0x3f   :  { %128 = vadd.xlane.f32.xlu1 %v127_v13 }
  0x40   :  { %102 = vadd.xlane.f32.xlu0 %v101_v15 }
  0x79   :  { %v138_v16 = vpop.xlane.xlu2 %137 }
  0x7a   :  { %v106_v17 = vpop.xlane.xlu1 %105 }
  0x7b   :  { %v74_v18 = vpop.xlane.xlu0 %73 }
  0x7c   :  { %v152_v22 = vmax.f32 %v74_v18, %v106_v17 }
  0x7e   :  { %v160_v23 = vmax.f32 %v152_v22, %v138_v16 }
  0x80   :  { %v168_v24 = vsub.f32 %v74_v18, %v160_v23  ;;  %v192_v25 = vsub.f32 %v106_v17, %v160_v23  ;;  %v216_v26 = vsub.f32 %v138_v16, %v160_v23 }
  0x81   :  { %v144_v1 = vpop.xlane.xlu2 %143 }
  0x82   :  { %v180_v27 = vmul.f32 1.442695, %v168_v24  ;;  %v204_v31 = vmul.f32 1.442695, %v192_v25  ;;  %v112_v32 = vpop.xlane.xlu1 %111  ;;  %v228_v33 = vmul.f32 1.442695, %v216_v26 }
  0x83   :  { %v80_v34 = vpop.xlane.xlu0 %79 }
  0x84   :  { %551 = vpow2.f32 %v180_v27  ;;  %v154_v35 = vmax.f32 %v80_v34, %v112_v32 }
  0x85   :  { %553 = vpow2.f32 %v204_v31 }
  0x86   :  { %v162_v40 = vmax.f32 %v154_v35, %v144_v1  ;;  %555 = vpow2.f32 %v228_v33 }
  0x88   :  { %v170_v41 = vsub.f32 %v80_v34, %v162_v40  ;;  %v194_v42 = vsub.f32 %v112_v32, %v162_v40  ;;  %v218_v43 = vsub.f32 %v144_v1, %v162_v40 }
  0x89   :  { %v852_v50 = vpop.xlane.xlu2 %93 }
  0x8a   :  { %v850_v44 = vpop.eup %551  ;;  %v184_v45 = vmul.f32 1.442695, %v170_v41  ;;  %v208_v49 = vmul.f32 1.442695, %v194_v42  ;;  %v854_v51 = vpop.xlane.xlu1 %67  ;;  %v232_v53 = vmul.f32 1.442695, %v218_v43 }
  0x8b   :  { %v856_v52 = vpop.eup %553  ;;  %v62_v54 = vpop.xlane.xlu0 %61 }
  0x8c   :  { %v240_v58 = vadd.f32 %v856_v52, %v850_v44  ;;  %557 = vpow2.f32 %v184_v45  ;;  %v863_v60 = vpop.eup %555  ;;  %v148_v26 = vmax.f32 %v62_v54, %v852_v50 }
  0x8d   :  { %559 = vpow2.f32 %v208_v49 }
  0x8e   :  { %v248_v61 = vadd.f32 %v863_v60, %v240_v58  ;;  %561 = vpow2.f32 %v232_v53 }
  0x90   :  { %563 = vrcp.f32 %v248_v61  ;;  %v321_v23 = vand.u32 2147483647, %v248_v61  ;;  %v323_v24 = vand.u32 2147483648, %v248_v61  ;;  %vm317_vm2 = vweird.f32 %v248_v61 }
  0x91   :  { %v874_v10 = vpop.xlane.xlu2 %82 }
  0x92   :  { %v872_v9 = vpop.eup %557  ;;  %v876_v11 = vpop.xlane.xlu1 %76  ;;  %vm888_vm3 = vcmp.eq.f32.partialorder %v321_v23, 8.507059e+37  ;;  %v324_v35 = vor.u32 1.1754944e-38, %v323_v24 }
  0x93   :  { %v878_v13 = vpop.eup %559  ;;  %v880_v14 = vpop.xlane.xlu0 %99 }
  0x94   :  { %v242_v15 = vadd.f32 %v878_v13, %v872_v9  ;;  %v884_v16 = vpop.eup %561  ;;  %v150_v53 = vmax.f32 %v854_v51, %v880_v14 }
  0x96   :  { %v564_v17 = vpop.eup %563  ;;  %v250_v18 = vadd.f32 %v884_v16, %v242_v15 }
  0x97   :  { %v313_v22 = vmul.f32 %v564_v17, %v248_v61  ;;  %vm318_vm1 = vweird.f32 %v564_v17 }
  0x98   :  { %565 = vrcp.f32 %v250_v18  ;;  %vm319_vm4 = vmor %vm317_vm2, %vm318_vm1  ;;  %vm347_vm5 = vweird.f32 %v250_v18  ;;  %v351_v45 = vand.u32 2147483647, %v250_v18  ;;  %v353_v49 = vand.u32 2147483648, %v250_v18 }
  0x99   :  { %v314_v25 = vsub.f32 1.0, %v313_v22  ;;  %v126_v27 = vpop.xlane.xlu2 %125 }
  0x9a   :  { %v115_v31 = vpop.xlane.xlu1 %114  ;;  %v156_v32 = vmax.f32 %v148_v26, %v126_v27  ;;  %vm901_vm6 = vcmp.eq.f32.partialorder %v351_v45, 8.507059e+37 }
  0x9b   :  { %v315_v1 = vmul.f32 %v564_v17, %v314_v25  ;;  %v109_v33 = vpop.xlane.xlu0 %108  ;;  %v155_v62 = vmax.f32 %v874_v10, %v115_v31 }
  0x9c   :  { %v164_v40 = vsub.f32 %v62_v54, %v156_v32  ;;  %v188_v41 = vsub.f32 %v852_v50, %v156_v32  ;;  %v212_v42 = vsub.f32 %v126_v27, %v156_v32  ;;  %v153_v50 = vmax.f32 %v876_v11, %v109_v33 }
  0x9d   :  { %v316_v36 = vadd.f32 %v564_v17, %v315_v1 }
  0x9e   :  { %v566_v43 = vpop.eup %565  ;;  %v172_v61 = vmul.f32 1.442695, %v164_v40  ;;  %v196_v54 = vmul.f32 1.442695, %v188_v41  ;;  %v220_v15 = vmul.f32 1.442695, %v212_v42 }
  0x9f   :  { %v320_v58 = vsel %vm319_vm4, %v564_v17, %v316_v36  ;;  %v343_v59 = vmul.f32 %v566_v43, %v250_v18  ;;  %v354_v17 = vor.u32 1.1754944e-38, %v353_v49  ;;  %vm348_vm7 = vweird.f32 %v566_v43 }
  0xa0   :  { %v325_v63 = vsel %vm888_vm3, %v324_v35, %v320_v58  ;;  %567 = vpow2.f32 %v172_v61  ;;  %vm349_vm8 = vmor %vm347_vm5, %vm348_vm7 }
  0xa1   :  { %v376_v22 = vmul.f32 %v850_v44, %v325_v63  ;;  %v344_v23 = vsub.f32 1.0, %v343_v59  ;;  %v392_v24 = vmul.f32 %v856_v52, %v325_v63  ;;  %569 = vpow2.f32 %v196_v54  ;;  %v147_v26 = vpop.xlane.xlu2 %146 }
  0xa2   :  { %v141_v27 = vpop.xlane.xlu1 %140  ;;  %v416_v1 = vmul.f32 %v863_v60, %v325_v63  ;;  %v163_v34 = vmax.f32 %v155_v62, %v147_v26  ;;  %571 = vpow2.f32 %v220_v15 }
  0xa3   :  { %v345_v32 = vmul.f32 %v566_v43, %v344_v23  ;;  %v161_v35 = vmax.f32 %v153_v50, %v141_v27  ;;  %v132_v36 = vpop.xlane.xlu0 %131  ;;  %v384_v40 = vmul.f32 %v376_v22, %v668_v3  ;;  %v400_v52 = vmul.f32 %v392_v24, %v663_v2 }
  0xa4   :  { %v158_v44 = vmax.f32 %v150_v53, %v132_v36  ;;  %v171_v42 = vsub.f32 %v874_v10, %v163_v34  ;;  %v195_v45 = vsub.f32 %v115_v31, %v163_v34  ;;  %v219_v49 = vsub.f32 %v147_v26, %v163_v34 }
  0xa5   :  { %v346_v41 = vadd.f32 %v566_v43, %v345_v32  ;;  %v169_v60 = vsub.f32 %v876_v11, %v161_v35  ;;  %v193_v58 = vsub.f32 %v109_v33, %v161_v35  ;;  %v217_v59 = vsub.f32 %v141_v27, %v161_v35 }
  0xa6   :  { %v424_v61 = vmul.f32 %v416_v1, %v653_v0  ;;  %v912_v62 = vpop.eup %567  ;;  %v186_v63 = vmul.f32 1.442695, %v171_v42  ;;  %v210_v3 = vmul.f32 1.442695, %v195_v45  ;;  %v234_v54 = vmul.f32 1.442695, %v219_v49 }
  0xa7   :  { %v350_v53 = vsel %vm349_vm8, %v566_v43, %v346_v41  ;;  %v914_v2 = vpop.eup %569  ;;  %v182_v31 = vmul.f32 1.442695, %v169_v60  ;;  %v206_v18 = vmul.f32 1.442695, %v193_v58  ;;  %v166_v15 = vsub.f32 %v854_v51, %v158_v44 }
  0xa8   :  { %v355_v10 = vsel %vm901_vm6, %v354_v17, %v350_v53  ;;  %v236_v0 = vadd.f32 %v914_v2, %v912_v62  ;;  %573 = vpow2.f32 %v186_v63  ;;  %v230_v33 = vmul.f32 1.442695, %v217_v59  ;;  %v922_v43 = vpop.eup %571 }
  0xa9   :  { %v378_v11 = vmul.f32 %v872_v9, %v355_v10  ;;  %575 = vpow2.f32 %v210_v3  ;;  %v190_v50 = vsub.f32 %v880_v14, %v158_v44  ;;  %v214_v22 = vsub.f32 %v132_v36, %v158_v44  ;;  %v97_v51 = vpop.xlane.xlu2 %96 }
  0xaa   :  { %v408_v23 = vadd.f32 %v400_v52, %v384_v40  ;;  %v925_v24 = vpop.xlane.xlu1 %70  ;;  %v928_v25 = vadd.f32 %v922_v43, %v236_v0  ;;  %577 = vpow2.f32 %v234_v54  ;;  %v394_v26 = vmul.f32 %v878_v13, %v355_v10 }
  0xab   :  { %v65_v9 = vpop.xlane.xlu0 %64  ;;  %v386_v17 = vmul.f32 %v378_v11, %v692_v12  ;;  %579 = vpow2.f32 %v182_v31  ;;  %v176_v27 = vmul.f32 1.442695, %v166_v15  ;;  %v200_v14 = vmul.f32 1.442695, %v190_v50 }
  0xac   :  { %v432_v1 = vadd.f32 %v424_v61, %v408_v23  ;;  %581 = vrcp.f32 %v928_v25  ;;  %v402_v32 = vmul.f32 %v394_v26, %v684_v8  ;;  %v418_v34 = vmul.f32 %v884_v16, %v355_v10 }
  0xad   :  { %583 = vpow2.f32 %v206_v18  ;;  %v224_v44 = vmul.f32 1.442695, %v214_v22  ;;  %v149_v16 = vmax.f32 %v65_v9, %v97_v51  ;;  %v261_v15 = vand.u32 2147483647, %v928_v25 }
  0xae   :  { %v440_v35 = vmax.f32 %v432_v1, 0.0  ;;  %v935_v36 = vpop.eup %573  ;;  %585 = vpow2.f32 %v230_v33  ;;  %v410_v40 = vadd.f32 %v402_v32, %v386_v17  ;;  %v426_v12 = vmul.f32 %v418_v34, %v679_v7 }
  0xaf   :  { %v938_v13 = vpop.eup %575  ;;  %587 = vpow2.f32 %v176_v27  ;;  %v263_v22 = vand.u32 2147483648, %v928_v25  ;;  %vm257_vm10 = vweird.f32 %v928_v25  ;;  %vm262_vm12 = vcmp.eq.f32.partialorder %v261_v15, 8.507059e+37 }
  0xb0   :  { %533 = vmatmul.msk.f32.vlgmr.msra.gmra.mxu2 %vm59_vm0, %v440_v35  ;;  %v941_v52 = vpop.eup %577  ;;  %v243_v8 = vadd.f32 %v938_v13, %v935_v36  ;;  %589 = vpow2.f32 %v200_v14  ;;  %v434_v41 = vadd.f32 %v426_v12, %v410_v40 }
  0xb1   :  { %v945_v42 = vpop.eup %579  ;;  %591 = vpow2.f32 %v224_v44  ;;  %v135_v59 = vpop.xlane.xlu2 %134 }
  0xb2   :  { %v129_v45 = vpop.xlane.xlu1 %128  ;;  %v582_v49 = vpop.eup %581  ;;  %v442_v60 = vmax.f32 %v434_v41, 0.0  ;;  %v950_v53 = vadd.f32 %v941_v52, %v243_v8 }
  0xb3   :  { %v157_v7 = vmax.f32 %v149_v16, %v129_v45  ;;  %v103_v58 = vpop.xlane.xlu0 %102  ;;  %v947_v61 = vpop.eup %583  ;;  %v253_v3 = vmul.f32 %v582_v49, %v928_v25  ;;  %vm258_vm9 = vweird.f32 %v582_v49 }
  0xb4   :  { %v151_v63 = vmax.f32 %v925_v24, %v103_v58  ;;  %v954_v54 = vpop.eup %585  ;;  %v241_v10 = vadd.f32 %v947_v61, %v945_v42  ;;  %535 = vmatmul.msk.f32.vlgmr.msra.gmra.mxu3 %vm59_vm0, %v442_v60  ;;  %593 = vrcp.f32 %v950_v53  ;;  %vm259_vm11 = vmor %vm257_vm10, %vm258_vm9  ;;  %vm362_vm13 = vweird.f32 %v950_v53 }
  0xb5   :  { %v165_v31 = vsub.f32 %v65_v9, %v157_v7  ;;  %v189_v18 = vsub.f32 %v97_v51, %v157_v7  ;;  %v960_v11 = vpop.eup %587  ;;  %v213_v0 = vsub.f32 %v129_v45, %v157_v7  ;;  %v254_v50 = vsub.f32 1.0, %v253_v3 }
  0xb6   :  { %v159_v33 = vmax.f32 %v151_v63, %v135_v59  ;;  %v963_v23 = vpop.eup %589  ;;  %v966_v17 = vadd.f32 %v954_v54, %v241_v10 }
  0xb7   :  { %v174_v26 = vmul.f32 1.442695, %v165_v31  ;;  %v198_v27 = vmul.f32 1.442695, %v189_v18  ;;  %v238_v51 = vadd.f32 %v963_v23, %v960_v11  ;;  %v972_v14 = vpop.eup %591  ;;  %v222_v32 = vmul.f32 1.442695, %v213_v0 }
  0xb8   :  { %v167_v9 = vsub.f32 %v925_v24, %v159_v33  ;;  %v191_v1 = vsub.f32 %v103_v58, %v159_v33  ;;  %595 = vrcp.f32 %v966_v17  ;;  %v215_v34 = vsub.f32 %v135_v59, %v159_v33 }
  0xb9   :  { %v255_v35 = vmul.f32 %v582_v49, %v254_v50  ;;  %v976_v44 = vadd.f32 %v972_v14, %v238_v51  ;;  %597 = vpow2.f32 %v174_v26  ;;  %v264_v24 = vor.u32 1.1754944e-38, %v263_v22 }
  0xba   :  { %v178_v40 = vmul.f32 1.442695, %v167_v9  ;;  %599 = vpow2.f32 %v198_v27  ;;  %v202_v12 = vmul.f32 1.442695, %v191_v1  ;;  %v226_v16 = vmul.f32 1.442695, %v215_v34  ;;  %v981_v45 = vpop.eup %593 }
  0xbb   :  { %v256_v8 = vadd.f32 %v582_v49, %v255_v35  ;;  %601 = vrcp.f32 %v976_v44  ;;  %v336_v7 = vand.u32 2147483647, %v966_v17  ;;  %v366_v58 = vand.u32 2147483647, %v950_v53 }
  0xbc   :  { %603 = vpow2.f32 %v222_v32  ;;  %v291_v10 = vand.u32 2147483647, %v976_v44  ;;  %v293_v31 = vand.u32 2147483648, %v976_v44  ;;  %vm332_vm14 = vweird.f32 %v966_v17 }
  0xbd   :  { %v260_v41 = vsel %vm259_vm11, %v582_v49, %v256_v8  ;;  %605 = vpow2.f32 %v178_v40  ;;  %vm287_vm15 = vweird.f32 %v976_v44  ;;  %vm1004_vm1 = vcmp.eq.f32.partialorder %v336_v7, 8.507059e+37 }
  0xbe   :  { %v265_v60 = vsel %vm262_vm12, %v264_v24, %v260_v41  ;;  %v596_v59 = vpop.eup %595  ;;  %607 = vpow2.f32 %v202_v12  ;;  %v338_v26 = vand.u32 2147483648, %v966_v17  ;;  %vm363_vm3 = vweird.f32 %v981_v45 }
  0xbf   :  { %v372_v25 = vmul.f32 %v912_v62, %v265_v60  ;;  %v388_v63 = vmul.f32 %v914_v2, %v265_v60  ;;  %v412_v3 = vmul.f32 %v922_v43, %v265_v60  ;;  %v989_v49 = vpop.eup %597  ;;  %v328_v18 = vmul.f32 %v596_v59, %v966_v17  ;;  %vm364_vm6 = vmor %vm362_vm13, %vm363_vm3 }
  0xc0   :  { %v995_v15 = vpop.eup %599  ;;  %609 = vpow2.f32 %v226_v16  ;;  %v358_v43 = vmul.f32 %v981_v45, %v950_v53  ;;  %vm333_vm2 = vweird.f32 %v596_v59  ;;  %v339_v41 = vor.u32 1.1754944e-38, %v338_v26 }
  0xc1   :  { %v380_v62 = vmul.f32 %v372_v25, %v716_v21  ;;  %v396_v2 = vmul.f32 %v388_v63, %v706_v19  ;;  %v602_v0 = vpop.eup %601  ;;  %v237_v33 = vadd.f32 %v995_v15, %v989_v49  ;;  %v329_v50 = vsub.f32 1.0, %v328_v18  ;;  %vm334_vm5 = vmor %vm332_vm14, %vm333_vm2 }
  0xc2   :  { %v1009_v27 = vpop.eup %603  ;;  %v420_v19 = vmul.f32 %v412_v3, %v754_v37  ;;  %v283_v51 = vmul.f32 %v602_v0, %v976_v44  ;;  %v359_v9 = vsub.f32 1.0, %v358_v43  ;;  %v368_v37 = vand.u32 2147483648, %v950_v53 }
  0xc3   :  { %v404_v21 = vadd.f32 %v396_v2, %v380_v62  ;;  %v1013_v1 = vpop.eup %605  ;;  %v1016_v32 = vadd.f32 %v1009_v27, %v237_v33  ;;  %v330_v34 = vmul.f32 %v596_v59, %v329_v50  ;;  %vm288_vm4 = vweird.f32 %v602_v0 }
  0xc4   :  { %v1019_v35 = vpop.eup %607  ;;  %v284_v12 = vsub.f32 1.0, %v283_v51  ;;  %v360_v8 = vmul.f32 %v981_v45, %v359_v9  ;;  %v294_v18 = vor.u32 1.1754944e-38, %v293_v31  ;;  %vm367_vm7 = vcmp.eq.f32.partialorder %v366_v58, 8.507059e+37  ;;  %vm289_vm8 = vmor %vm287_vm15, %vm288_vm4 }
  0xc5   :  { %v428_v40 = vadd.f32 %v420_v19, %v404_v21  ;;  %611 = vrcp.f32 %v1016_v32  ;;  %v239_v24 = vadd.f32 %v1019_v35, %v1013_v1  ;;  %v331_v16 = vadd.f32 %v596_v59, %v330_v34 }
  0xc6   :  { %v1026_v60 = vpop.eup %609  ;;  %v285_v25 = vmul.f32 %v602_v0, %v284_v12  ;;  %v361_v63 = vadd.f32 %v981_v45, %v360_v8  ;;  %v369_v33 = vor.u32 1.1754944e-38, %v368_v37  ;;  %vm292_vm9 = vcmp.eq.f32.partialorder %v291_v10, 8.507059e+37 }
  0xc7   :  { %v436_v7 = vmax.f32 %v428_v40, 0.0  ;;  %v1033_v3 = vadd.f32 %v1026_v60, %v239_v24  ;;  %v335_v62 = vsel %vm334_vm5, %v596_v59, %v331_v16  ;;  %v276_v22 = vand.u32 2147483647, %v1016_v32 }
  0xc8   :  { %v286_v2 = vadd.f32 %v602_v0, %v285_v25  ;;  %v340_v17 = vsel %vm1004_vm1, %v339_v41, %v335_v62  ;;  %v365_v43 = vsel %vm364_vm6, %v981_v45, %v361_v63  ;;  %v278_v40 = vand.u32 2147483648, %v1016_v32 }
  0xc9   :  { %529 = vmatmul.msk.f32.vlgmr.msra.gmra.mxu0 %vm59_vm0, %v436_v7  ;;  %613 = vrcp.f32 %v1033_v3  ;;  %v377_v59 = vmul.f32 %v945_v42, %v340_v17  ;;  %v393_v53 = vmul.f32 %v947_v61, %v340_v17  ;;  %v417_v58 = vmul.f32 %v954_v54, %v340_v17 }
  0xca   :  { %v290_v31 = vsel %vm289_vm8, %v602_v0, %v286_v2  ;;  %v370_v50 = vsel %vm367_vm7, %v369_v33, %v365_v43  ;;  %vm272_vm11 = vweird.f32 %v1016_v32  ;;  %vm277_vm12 = vcmp.eq.f32.partialorder %v276_v22, 8.507059e+37 }
  0xcb   :  { %v612_v26 = vpop.eup %611  ;;  %v295_v21 = vsel %vm292_vm9, %v294_v18, %v290_v31  ;;  %v385_v45 = vmul.f32 %v377_v59, %v735_v29  ;;  %v401_v19 = vmul.f32 %v393_v53, %v764_v39  ;;  %v425_v44 = vmul.f32 %v417_v58, %v783_v47 }
  0xcc   :  { %v268_v51 = vmul.f32 %v612_v26, %v1016_v32  ;;  %v374_v42 = vmul.f32 %v960_v11, %v295_v21  ;;  %v390_v61 = vmul.f32 %v963_v23, %v295_v21  ;;  %v414_v54 = vmul.f32 %v972_v14, %v295_v21 }
  0xcd   :  { %v409_v10 = vadd.f32 %v401_v19, %v385_v45  ;;  %v379_v0 = vmul.f32 %v935_v36, %v370_v50  ;;  %v395_v9 = vmul.f32 %v938_v13, %v370_v50  ;;  %v419_v34 = vmul.f32 %v941_v52, %v370_v50 }
  0xce   :  { %v382_v29 = vmul.f32 %v374_v42, %v711_v20  ;;  %v398_v39 = vmul.f32 %v390_v61, %v740_v30  ;;  %v269_v47 = vsub.f32 1.0, %v268_v51  ;;  %v422_v11 = vmul.f32 %v414_v54, %v788_v48 }
  0xcf   :  { %v614_v12 = vpop.eup %613  ;;  %v433_v23 = vadd.f32 %v425_v44, %v409_v10  ;;  %v387_v14 = vmul.f32 %v379_v0, %v730_v28  ;;  %v403_v8 = vmul.f32 %v395_v9, %v759_v38  ;;  %vm273_vm10 = vweird.f32 %v612_v26 }
  0xd0   :  { %v298_v36 = vmul.f32 %v614_v12, %v1033_v3  ;;  %v406_v13 = vadd.f32 %v398_v39, %v382_v29  ;;  %v270_v37 = vmul.f32 %v612_v26, %v269_v47  ;;  %v427_v30 = vmul.f32 %v419_v34, %v778_v46  ;;  %vm274_vm13 = vmor %vm272_vm11, %vm273_vm10 }
  0xd1   :  { %v441_v52 = vmax.f32 %v433_v23, 0.0  ;;  %v411_v20 = vadd.f32 %v403_v8, %v387_v14  ;;  %v279_v38 = vor.u32 1.1754944e-38, %v278_v40  ;;  %vm303_vm14 = vweird.f32 %v614_v12 }
  0xd2   :  { %v430_v24 = vadd.f32 %v422_v11, %v406_v13  ;;  %v271_v16 = vadd.f32 %v612_v26, %v270_v37  ;;  %v299_v48 = vsub.f32 1.0, %v298_v36  ;;  %v308_v41 = vand.u32 2147483648, %v1033_v3 }
  0xd3   :  { %534 = vmatmul.msk.f32.gmra.mxu2 %vm59_vm0, %v441_v52  ;;  %v435_v28 = vadd.f32 %v427_v30, %v411_v20  ;;  %v306_v18 = vand.u32 2147483647, %v1033_v3  ;;  %vm302_vm15 = vweird.f32 %v1033_v3 }
  0xd4   :  { %v438_v7 = vmax.f32 %v430_v24, 0.0  ;;  %v275_v25 = vsel %vm274_vm13, %v612_v26, %v271_v16  ;;  %v300_v63 = vmul.f32 %v614_v12, %v299_v48  ;;  %vm304_vm1 = vmor %vm302_vm15, %vm303_vm14  ;;  %v309_v33 = vor.u32 1.1754944e-38, %v308_v41 }
  0xd5   :  { %v443_v46 = vmax.f32 %v435_v28, 0.0  ;;  %v280_v62 = vsel %vm277_vm12, %v279_v38, %v275_v25  ;;  %vm307_vm2 = vcmp.eq.f32.partialorder %v306_v18, 8.507059e+37 }
  0xd6   :  { %531 = vmatmul.msk.f32.vlgmr.msra.gmra.mxu1 %vm59_vm0, %v438_v7  ;;  %v373_v32 = vmul.f32 %v989_v49, %v280_v62  ;;  %v389_v2 = vmul.f32 %v995_v15, %v280_v62  ;;  %v413_v17 = vmul.f32 %v1009_v27, %v280_v62  ;;  %v301_v43 = vadd.f32 %v614_v12, %v300_v63 }
  0xd7   :  { %536 = vmatmul.msk.f32.gmra.mxu3 %vm59_vm0, %v443_v46 }
  0xd8   :  { %v381_v59 = vmul.f32 %v373_v32, %v812_v57  ;;  %v397_v53 = vmul.f32 %v389_v2, %v802_v55  ;;  %v305_v58 = vsel %vm304_vm1, %v614_v12, %v301_v43  ;;  %v421_v3 = vmul.f32 %v413_v17, %v826_v4 }
  0xd9   :  { %v310_v31 = vsel %vm307_vm2, %v309_v33, %v305_v58 }
  0xda   :  { %v405_v49 = vadd.f32 %v397_v53, %v381_v59  ;;  %v375_v15 = vmul.f32 %v1013_v1, %v310_v31  ;;  %v391_v27 = vmul.f32 %v1019_v35, %v310_v31  ;;  %v415_v50 = vmul.f32 %v1026_v60, %v310_v31  ;;  %v550_v1 = vld [vmem:[%s1129_s5] ss:$0 sm:$0xff] }
  0xdc   :  { %v429_v22 = vadd.f32 %v421_v3, %v405_v49  ;;  %v383_v26 = vmul.f32 %v375_v15, %v807_v56  ;;  %v399_v21 = vmul.f32 %v391_v27, %v836_v6  ;;  %v423_v55 = vmul.f32 %v415_v50, %v831_v5 }
  0xde   :  { %v437_v57 = vmax.f32 %v429_v22, 0.0  ;;  %v407_v45 = vadd.f32 %v399_v21, %v383_v26 }
  0xe0   :  { %530 = vmatmul.msk.f32.gmra.mxu0 %vm59_vm0, %v437_v57  ;;  %v431_v4 = vadd.f32 %v423_v55, %v407_v45 }
  0xe2   :  { %v439_v19 = vmax.f32 %v431_v4, 0.0 }
  0xe4   :  { %532 = vmatmul.msk.f32.gmra.mxu1 %vm59_vm0, %v439_v19 }
 0x133   :  { %v505_v35 = vpop.f32.mrf.mxu2 }
 0x134   :  { %v506_v60 = vadd.f32 %v550_v1, %v505_v35 }
 0x136   :  { %521 = vst.msk [vmem:[%s1131_s6 + $0x20] sm:$0xff] %vm59_vm0, %v506_v60 }
 0x137   :  { %v511_v56 = vpop.f32.mrf.mxu3 }
 0x138   :  { %v512_v6 = vadd.f32 %v550_v1, %v511_v56 }
 0x13a   :  { %523 = vst.msk [vmem:[%s1131_s6 + $0x30] sm:$0xff] %vm59_vm0, %v512_v6 }
 0x146   :  { %v493_v5 = vpop.f32.mrf.mxu0 }
 0x147   :  { %v494_v44 = vadd.f32 %v550_v1, %v493_v5 }
 0x149   :  { %517 = vst.msk [vmem:[%s1131_s6] sm:$0xff] %vm59_vm0, %v494_v44 }
 0x153   :  { %v499_v51 = vpop.f32.mrf.mxu1 }
 0x154   :  { %v500_v42 = vadd.f32 %v550_v1, %v499_v51 }
 0x156   :  { %519 = vst.msk [vmem:[%s1131_s6 + $0x10] sm:$0xff] %vm59_vm0, %v500_v42  ;;  %v508_v61 = vpop.f32.mrf.mxu2 }
 0x157   :  { %v509_v54 = vadd.f32 %v550_v1, %v508_v61 }
 0x159   :  { %522 = vst.msk [vmem:[%s1131_s6 + $0x28] sm:$0xff] %vm59_vm0, %v509_v54 }
 0x15a   :  { %v514_v10 = vpop.f32.mrf.mxu3 }
 0x15b   :  { %v515_v0 = vadd.f32 %v550_v1, %v514_v10 }
 0x15d   :  { %524 = vst.msk [vmem:[%s1131_s6 + $0x38] sm:$0xff] %vm59_vm0, %v515_v0  ;;  %v496_v9 = vpop.f32.mrf.mxu0 }
 0x15e   :  { %v497_v34 = vadd.f32 %v550_v1, %v496_v9 }
 0x160   :  { %518 = vst.msk [vmem:[%s1131_s6 + $0x8] sm:$0xff] %vm59_vm0, %v497_v34 }
 0x161   :  { %v502_v29 = vpop.f32.mrf.mxu1 }
 0x162   :  { %v503_v39 = vadd.f32 %v550_v1, %v502_v29 }
 0x164   :  { %520 = vst.msk [vmem:[%s1131_s6 + $0x18] sm:$0xff] %vm59_vm0, %v503_v39 }

</bundles_post_ra>
